<compile_context>
chip_gen: v7x
topology: tpu7x:2x2x1
jax: 0.10.0
libtpu: 0.0.40
codegen_flags: <defaults>
</compile_context>

<pallas_src>
import math
import functools

import jax
import jax.numpy as jnp
from jax import lax
from jax.experimental import pallas as pl
from jax.experimental.pallas import tpu as pltpu


def _cross_attn_kernel(hidden_ref, query_ref,
                       wq_ref, bq_ref, wk_ref, bk_ref, wv_ref, bv_ref,
                       out_ref, *, num_heads, head_dim):
    """One (batch, query-tile) grid step: all heads, single lane-dense store."""
    h_in = hidden_ref[0].astype(jnp.bfloat16)   # (Sk, Hd)
    q_in = query_ref[0].astype(jnp.bfloat16)    # (TQ, Hd)

    # QKV projections on the MXU: bf16 operands, f32 accumulation, f32 bias add.
    q = jnp.dot(q_in, wq_ref[...], preferred_element_type=jnp.float32) + bq_ref[...]
    k = jnp.dot(h_in, wk_ref[...], preferred_element_type=jnp.float32) + bk_ref[...]
    v = jnp.dot(h_in, wv_ref[...], preferred_element_type=jnp.float32) + bv_ref[...]

    # Fold the 1/sqrt(head_dim) score scaling into q once (scaling q -- bias
    # included -- is exactly equivalent to scaling the scores).
    q = q * (1.0 / math.sqrt(head_dim))

    ctx_heads = []
    for hh in range(num_heads):   # num_heads is small and static
        sl = slice(hh * head_dim, (hh + 1) * head_dim)
        qh = q[:, sl].astype(jnp.bfloat16)   # (TQ, D)
        kh = k[:, sl].astype(jnp.bfloat16)   # (Sk, D)
        vh = v[:, sl].astype(jnp.bfloat16)   # (Sk, D)

        # QK^T: contract the last axis of both operands (no kh.T relayout).
        scores = lax.dot_general(qh, kh, (((1,), (1,)), ((), ())),
                                 preferred_element_type=jnp.float32)  # (TQ, Sk)

        # PyTorch adds a constant +1 to every score; softmax is shift-invariant,
        # so with the max-subtraction below dropping it is an exact no-op.
        scores = scores - jnp.max(scores, axis=-1, keepdims=True)
        p = jnp.exp(scores)                                           # f32 VPU/EUP
        denom = jnp.sum(p, axis=-1, keepdims=True)                    # (TQ, 1)

        # Dropout: identity (eval mode).
        ctx = jnp.dot(p.astype(jnp.bfloat16), vh,
                      preferred_element_type=jnp.float32)             # (TQ, D)
        # Normalize after the PV matmul: (TQ, D) multiply instead of a
        # (TQ, Sk) divide; reciprocal runs on the EUP slot.
        ctx = ctx * pl.reciprocal(denom, approx=True)
        ctx_heads.append(ctx)

    # Single lane-dense (TQ, Hd) store of the full output tile.
    out_ref[0] = jnp.concatenate(ctx_heads, axis=-1).astype(out_ref.dtype)


def _pick_q_tile(sq):
    for t in (256, 128):
        if sq % t == 0:
            return t
    return sq   # small / ragged sequences: one full-Sq tile


def bert_cross_attention(hidden_states, query_states, params, num_heads):
    B, Sk, Hd = hidden_states.shape
    Bq, Sq, Hq = query_states.shape
    assert B == Bq and Hd == Hq and Hd % num_heads == 0
    head_dim = Hd // num_heads

    tq = _pick_q_tile(Sq)
    n_qt = Sq // tq

    # Cast weights to bf16 once (halves their HBM->VMEM traffic and the
    # double-buffered weight VMEM footprint); biases stay f32.
    wq = params["wq"].astype(jnp.bfloat16)
    wk = params["wk"].astype(jnp.bfloat16)
    wv = params["wv"].astype(jnp.bfloat16)
    bq = params["bq"].astype(jnp.float32)
    bk = params["bk"].astype(jnp.float32)
    bv = params["bv"].astype(jnp.float32)

    kernel = functools.partial(_cross_attn_kernel,
                               num_heads=num_heads, head_dim=head_dim)

    grid_spec = pltpu.PrefetchScalarGridSpec(
        num_scalar_prefetch=0,
        grid=(B, n_qt),
        in_specs=[
            pl.BlockSpec((1, Sk, Hd), lambda b, qi: (b, 0, 0)),   # hidden_states
            pl.BlockSpec((1, tq, Hd), lambda b, qi: (b, qi, 0)),  # query_states
            pl.BlockSpec((Hd, Hd), lambda b, qi: (0, 0)),         # Wq (bf16)
            pl.BlockSpec((1, Hd), lambda b, qi: (0, 0)),          # bq
            pl.BlockSpec((Hd, Hd), lambda b, qi: (0, 0)),         # Wk (bf16)
            pl.BlockSpec((1, Hd), lambda b, qi: (0, 0)),          # bk
            pl.BlockSpec((Hd, Hd), lambda b, qi: (0, 0)),         # Wv (bf16)
            pl.BlockSpec((1, Hd), lambda b, qi: (0, 0)),          # bv
        ],
        out_specs=pl.BlockSpec((1, tq, Hd), lambda b, qi: (b, qi, 0)),
    )

    return pl.pallas_call(
        kernel,
        out_shape=jax.ShapeDtypeStruct((B, Sq, Hd), jnp.float32),
        grid_spec=grid_spec,
        compiler_params=pltpu.CompilerParams(
            dimension_semantics=("parallel", "parallel"),
            vmem_limit_bytes=64 * 1024 * 1024),
    )(hidden_states, query_states, wq, bq, wk, bk, wv, bv)


def _reference(hidden_states, query_states, params, num_heads):
    """Pure-JAX f32 reference mirroring the PyTorch forward (eval mode)."""
    B, Sk, Hd = hidden_states.shape
    _, Sq, _ = query_states.shape
    D = Hd // num_heads

    def proj(x, w, b):
        return x @ w + b[0]

    q = proj(query_states, params["wq"], params["bq"])
    k = proj(hidden_states, params["wk"], params["bk"])
    v = proj(hidden_states, params["wv"], params["bv"])

    def split(x, S):
        return x.reshape(B, S, num_heads, D).transpose(0, 2, 1, 3)

    qh, kh, vh = split(q, Sq), split(k, Sk), split(v, Sk)
    scores = jnp.einsum("bhqd,bhkd->bhqk", qh, kh) / math.sqrt(D)
    scores = scores + 1.0           # the module's constant-shift "mask"
    probs = jax.nn.softmax(scores, axis=-1)
    ctx = jnp.einsum("bhqk,bhkd->bhqd", probs, vh)
    return ctx.transpose(0, 2, 1, 3).reshape(B, Sq, Hd)


if __name__ == "__main__":
    # Small config with hidden divisible by num_heads.
    B, Sq, Sk = 2, 8, 8
    hidden_size = 32
    num_heads = 2

    key = jax.random.PRNGKey(0)
    k_hs, k_qs, k_wq, k_bq, k_wk, k_bk, k_wv, k_bv = jax.random.split(key, 8)

    hidden_states = jax.random.normal(k_hs, (B, Sk, hidden_size), dtype=jnp.float32)
    query_states = jax.random.normal(k_qs, (B, Sq, hidden_size), dtype=jnp.float32)

    # Deterministic nn.Linear-like init, stored as (in, out).
    bound = 1.0 / math.sqrt(hidden_size)
    params = {
        "wq": jax.random.uniform(k_wq, (hidden_size, hidden_size), jnp.float32, -bound, bound),
        "bq": jax.random.uniform(k_bq, (1, hidden_size), jnp.float32, -bound, bound),
        "wk": jax.random.uniform(k_wk, (hidden_size, hidden_size), jnp.float32, -bound, bound),
        "bk": jax.random.uniform(k_bk, (1, hidden_size), jnp.float32, -bound, bound),
        "wv": jax.random.uniform(k_wv, (hidden_size, hidden_size), jnp.float32, -bound, bound),
        "bv": jax.random.uniform(k_bv, (1, hidden_size), jnp.float32, -bound, bound),
    }

    out = bert_cross_attention(hidden_states, query_states, params, num_heads)
    out = jax.block_until_ready(out)

    ref = _reference(hidden_states, query_states, params, num_heads)
    assert out.shape == (B, Sq, hidden_size)
    # Tolerance accounts for bf16 MXU operands + approx reciprocal vs. the f32 reference.
    assert jnp.allclose(out, ref, atol=3e-2, rtol=3e-2), "mismatch vs reference"

    print("KERNEL_OK")
</pallas_src>

<mosaic_0001>
module attributes {stable_mosaic.version = 11 : i64} {
  func.func @_cross_attn_kernel(%arg0: i32, %arg1: i32, %arg2: memref<1x8x32xf32, #tpu.memory_space<vmem>>, %arg3: memref<1x8x32xf32, #tpu.memory_space<vmem>>, %arg4: memref<32x32xbf16, #tpu.memory_space<vmem>>, %arg5: memref<1x32xf32, #tpu.memory_space<vmem>>, %arg6: memref<32x32xbf16, #tpu.memory_space<vmem>>, %arg7: memref<1x32xf32, #tpu.memory_space<vmem>>, %arg8: memref<32x32xbf16, #tpu.memory_space<vmem>>, %arg9: memref<1x32xf32, #tpu.memory_space<vmem>>, %arg10: memref<1x8x32xf32, #tpu.memory_space<vmem>>) attributes {dimension_semantics = [#tpu.dimension_semantics<parallel>, #tpu.dimension_semantics<parallel>], iteration_bounds = array<i64: 2, 1>, scalar_prefetch = 0 : i64, scratch_operands = 0 : i64, tpu.core_type = #tpu.core_type<tc>, window_params = [{transform_indices = @transform_0, window_bounds = array<i64: 1, 8, 32>}, {transform_indices = @transform_1, window_bounds = array<i64: 1, 8, 32>}, {pipeline_mode = #tpu.pipeline_mode<synchronous>, transform_indices = @transform_2, window_bounds = array<i64: 32, 32>}, {pipeline_mode = #tpu.pipeline_mode<synchronous>, transform_indices = @transform_3, window_bounds = array<i64: 1, 32>}, {pipeline_mode = #tpu.pipeline_mode<synchronous>, transform_indices = @transform_4, window_bounds = array<i64: 32, 32>}, {pipeline_mode = #tpu.pipeline_mode<synchronous>, transform_indices = @transform_5, window_bounds = array<i64: 1, 32>}, {pipeline_mode = #tpu.pipeline_mode<synchronous>, transform_indices = @transform_6, window_bounds = array<i64: 32, 32>}, {pipeline_mode = #tpu.pipeline_mode<synchronous>, transform_indices = @transform_7, window_bounds = array<i64: 1, 32>}, {transform_indices = @transform_8, window_bounds = array<i64: 1, 8, 32>}]} {
    %c0 = arith.constant 0 : index
    %c0_0 = arith.constant 0 : index
    %c0_1 = arith.constant 0 : index
    %0 = vector.load %arg2[%c0, %c0_0, %c0_1] : memref<1x8x32xf32, #tpu.memory_space<vmem>>, vector<1x8x32xf32>
    %1 = vector.shape_cast %0 : vector<1x8x32xf32> to vector<8x32xf32>
    %2 = arith.truncf %1 : vector<8x32xf32> to vector<8x32xbf16>
    %c0_2 = arith.constant 0 : index
    %c0_3 = arith.constant 0 : index
    %c0_4 = arith.constant 0 : index
    %3 = vector.load %arg3[%c0_2, %c0_3, %c0_4] : memref<1x8x32xf32, #tpu.memory_space<vmem>>, vector<1x8x32xf32>
    %4 = vector.shape_cast %3 : vector<1x8x32xf32> to vector<8x32xf32>
    %5 = arith.truncf %4 : vector<8x32xf32> to vector<8x32xbf16>
    %c0_5 = arith.constant 0 : index
    %c0_6 = arith.constant 0 : index
    %6 = vector.load %arg4[%c0_5, %c0_6] : memref<32x32xbf16, #tpu.memory_space<vmem>>, vector<32x32xbf16>
    %cst = arith.constant dense<0.000000e+00> : vector<8x32xf32>
    %7 = tpu.matmul %5, %6, %cst {dimension_numbers = #tpu.dot_dimension_numbers<[1], [0], [0], [1], [0, 0, 1, 1], [], []>} : vector<8x32xbf16>, vector<32x32xbf16>, vector<8x32xf32> -> vector<8x32xf32>
    %c0_7 = arith.constant 0 : index
    %c0_8 = arith.constant 0 : index
    %8 = vector.load %arg5[%c0_7, %c0_8] : memref<1x32xf32, #tpu.memory_space<vmem>>, vector<1x32xf32>
    %9 = vector.broadcast %8 : vector<1x32xf32> to vector<8x32xf32>
    %10 = arith.addf %7, %9 : vector<8x32xf32>
    %c0_9 = arith.constant 0 : index
    %c0_10 = arith.constant 0 : index
    %11 = vector.load %arg6[%c0_9, %c0_10] : memref<32x32xbf16, #tpu.memory_space<vmem>>, vector<32x32xbf16>
    %cst_11 = arith.constant dense<0.000000e+00> : vector<8x32xf32>
    %12 = tpu.matmul %2, %11, %cst_11 {dimension_numbers = #tpu.dot_dimension_numbers<[1], [0], [0], [1], [0, 0, 1, 1], [], []>} : vector<8x32xbf16>, vector<32x32xbf16>, vector<8x32xf32> -> vector<8x32xf32>
    %c0_12 = arith.constant 0 : index
    %c0_13 = arith.constant 0 : index
    %13 = vector.load %arg7[%c0_12, %c0_13] : memref<1x32xf32, #tpu.memory_space<vmem>>, vector<1x32xf32>
    %14 = vector.broadcast %13 : vector<1x32xf32> to vector<8x32xf32>
    %15 = arith.addf %12, %14 : vector<8x32xf32>
    %c0_14 = arith.constant 0 : index
    %c0_15 = arith.constant 0 : index
    %16 = vector.load %arg8[%c0_14, %c0_15] : memref<32x32xbf16, #tpu.memory_space<vmem>>, vector<32x32xbf16>
    %cst_16 = arith.constant dense<0.000000e+00> : vector<8x32xf32>
    %17 = tpu.matmul %2, %16, %cst_16 {dimension_numbers = #tpu.dot_dimension_numbers<[1], [0], [0], [1], [0, 0, 1, 1], [], []>} : vector<8x32xbf16>, vector<32x32xbf16>, vector<8x32xf32> -> vector<8x32xf32>
    %c0_17 = arith.constant 0 : index
    %c0_18 = arith.constant 0 : index
    %18 = vector.load %arg9[%c0_17, %c0_18] : memref<1x32xf32, #tpu.memory_space<vmem>>, vector<1x32xf32>
    %19 = vector.broadcast %18 : vector<1x32xf32> to vector<8x32xf32>
    %20 = arith.addf %17, %19 : vector<8x32xf32>
    %cst_19 = arith.constant 2.500000e-01 : f32
    %21 = vector.broadcast %cst_19 : f32 to vector<8x32xf32>
    %22 = arith.mulf %10, %21 : vector<8x32xf32>
    %23 = vector.extract_strided_slice %22 {offsets = [0, 0], sizes = [8, 16], strides = [1, 1]} : vector<8x32xf32> to vector<8x16xf32>
    %24 = arith.truncf %23 : vector<8x16xf32> to vector<8x16xbf16>
    %25 = vector.extract_strided_slice %15 {offsets = [0, 0], sizes = [8, 16], strides = [1, 1]} : vector<8x32xf32> to vector<8x16xf32>
    %26 = arith.truncf %25 : vector<8x16xf32> to vector<8x16xbf16>
    %27 = vector.extract_strided_slice %20 {offsets = [0, 0], sizes = [8, 16], strides = [1, 1]} : vector<8x32xf32> to vector<8x16xf32>
    %28 = arith.truncf %27 : vector<8x16xf32> to vector<8x16xbf16>
    %cst_20 = arith.constant dense<0.000000e+00> : vector<8x8xf32>
    %29 = tpu.matmul %24, %26, %cst_20 {dimension_numbers = #tpu.dot_dimension_numbers<[1], [1], [0], [0], [0, 0, 1, 0], [], []>} : vector<8x16xbf16>, vector<8x16xbf16>, vector<8x8xf32> -> vector<8x8xf32>
    %cst_21 = arith.constant dense<0xFF800000> : vector<8xf32>
    %30 = vector.multi_reduction <maximumf>, %29, %cst_21 [1] : vector<8x8xf32> to vector<8xf32>
    %31 = vector.shape_cast %30 : vector<8xf32> to vector<8x1xf32>
    %32 = vector.broadcast %31 : vector<8x1xf32> to vector<8x8xf32>
    %33 = arith.subf %29, %32 : vector<8x8xf32>
    %34 = math.exp %33 : vector<8x8xf32>
    %cst_22 = arith.constant dense<0.000000e+00> : vector<8xf32>
    %35 = vector.multi_reduction <add>, %34, %cst_22 [1] : vector<8x8xf32> to vector<8xf32>
    %36 = vector.shape_cast %35 : vector<8xf32> to vector<8x1xf32>
    %37 = arith.truncf %34 : vector<8x8xf32> to vector<8x8xbf16>
    %cst_23 = arith.constant dense<0.000000e+00> : vector<8x16xf32>
    %38 = tpu.matmul %37, %28, %cst_23 {dimension_numbers = #tpu.dot_dimension_numbers<[1], [0], [0], [1], [0, 0, 1, 1], [], []>} : vector<8x8xbf16>, vector<8x16xbf16>, vector<8x16xf32> -> vector<8x16xf32>
    %39 = tpu.reciprocal %36 {approx = true} : vector<8x1xf32> -> vector<8x1xf32>
    %40 = vector.broadcast %39 : vector<8x1xf32> to vector<8x16xf32>
    %41 = arith.mulf %38, %40 : vector<8x16xf32>
    %42 = vector.extract_strided_slice %22 {offsets = [0, 16], sizes = [8, 16], strides = [1, 1]} : vector<8x32xf32> to vector<8x16xf32>
    %43 = arith.truncf %42 : vector<8x16xf32> to vector<8x16xbf16>
    %44 = vector.extract_strided_slice %15 {offsets = [0, 16], sizes = [8, 16], strides = [1, 1]} : vector<8x32xf32> to vector<8x16xf32>
    %45 = arith.truncf %44 : vector<8x16xf32> to vector<8x16xbf16>
    %46 = vector.extract_strided_slice %20 {offsets = [0, 16], sizes = [8, 16], strides = [1, 1]} : vector<8x32xf32> to vector<8x16xf32>
    %47 = arith.truncf %46 : vector<8x16xf32> to vector<8x16xbf16>
    %cst_24 = arith.constant dense<0.000000e+00> : vector<8x8xf32>
    %48 = tpu.matmul %43, %45, %cst_24 {dimension_numbers = #tpu.dot_dimension_numbers<[1], [1], [0], [0], [0, 0, 1, 0], [], []>} : vector<8x16xbf16>, vector<8x16xbf16>, vector<8x8xf32> -> vector<8x8xf32>
    %cst_25 = arith.constant dense<0xFF800000> : vector<8xf32>
    %49 = vector.multi_reduction <maximumf>, %48, %cst_25 [1] : vector<8x8xf32> to vector<8xf32>
    %50 = vector.shape_cast %49 : vector<8xf32> to vector<8x1xf32>
    %51 = vector.broadcast %50 : vector<8x1xf32> to vector<8x8xf32>
    %52 = arith.subf %48, %51 : vector<8x8xf32>
    %53 = math.exp %52 : vector<8x8xf32>
    %cst_26 = arith.constant dense<0.000000e+00> : vector<8xf32>
    %54 = vector.multi_reduction <add>, %53, %cst_26 [1] : vector<8x8xf32> to vector<8xf32>
    %55 = vector.shape_cast %54 : vector<8xf32> to vector<8x1xf32>
    %56 = arith.truncf %53 : vector<8x8xf32> to vector<8x8xbf16>
    %cst_27 = arith.constant dense<0.000000e+00> : vector<8x16xf32>
    %57 = tpu.matmul %56, %47, %cst_27 {dimension_numbers = #tpu.dot_dimension_numbers<[1], [0], [0], [1], [0, 0, 1, 1], [], []>} : vector<8x8xbf16>, vector<8x16xbf16>, vector<8x16xf32> -> vector<8x16xf32>
    %58 = tpu.reciprocal %55 {approx = true} : vector<8x1xf32> -> vector<8x1xf32>
    %59 = vector.broadcast %58 : vector<8x1xf32> to vector<8x16xf32>
    %60 = arith.mulf %57, %59 : vector<8x16xf32>
    %61 = tpu.concatenate %41, %60 in 1 : vector<8x16xf32>, vector<8x16xf32> -> vector<8x32xf32>
    %c0_28 = arith.constant 0 : index
    %c0_29 = arith.constant 0 : index
    %c0_30 = arith.constant 0 : index
    %62 = vector.load %arg10[%c0_28, %c0_29, %c0_30] : memref<1x8x32xf32, #tpu.memory_space<vmem>>, vector<1x8x32xf32>
    %63 = vector.shape_cast %62 : vector<1x8x32xf32> to vector<8x32xf32>
    %64 = vector.shape_cast %61 : vector<8x32xf32> to vector<1x8x32xf32>
    tpu.vector_store %arg10[%c0_28, %c0_29, %c0_30], %64 {strides = array<i32>} : memref<1x8x32xf32, #tpu.memory_space<vmem>>, vector<1x8x32xf32>,
    return
  }
  func.func @transform_0(%arg0: i32, %arg1: i32) -> (i32, i32, i32) {
    %c0_i32 = arith.constant 0 : i32
    %c0_i32_0 = arith.constant 0 : i32
    %c0_i32_1 = arith.constant 0 : i32
    return %arg0, %c0_i32, %c0_i32_0 : i32, i32, i32
  }
  func.func @transform_1(%arg0: i32, %arg1: i32) -> (i32, i32, i32) {
    %c0_i32 = arith.constant 0 : i32
    %c0_i32_0 = arith.constant 0 : i32
    return %arg0, %arg1, %c0_i32 : i32, i32, i32
  }
  func.func @transform_2(%arg0: i32, %arg1: i32) -> (i32, i32) {
    %c0_i32 = arith.constant 0 : i32
    %c0_i32_0 = arith.constant 0 : i32
    %c0_i32_1 = arith.constant 0 : i32
    return %c0_i32, %c0_i32_0 : i32, i32
  }
  func.func @transform_3(%arg0: i32, %arg1: i32) -> (i32, i32) {
    %c0_i32 = arith.constant 0 : i32
    %c0_i32_0 = arith.constant 0 : i32
    %c0_i32_1 = arith.constant 0 : i32
    return %c0_i32, %c0_i32_0 : i32, i32
  }
  func.func @transform_4(%arg0: i32, %arg1: i32) -> (i32, i32) {
    %c0_i32 = arith.constant 0 : i32
    %c0_i32_0 = arith.constant 0 : i32
    %c0_i32_1 = arith.constant 0 : i32
    return %c0_i32, %c0_i32_0 : i32, i32
  }
  func.func @transform_5(%arg0: i32, %arg1: i32) -> (i32, i32) {
    %c0_i32 = arith.constant 0 : i32
    %c0_i32_0 = arith.constant 0 : i32
    %c0_i32_1 = arith.constant 0 : i32
    return %c0_i32, %c0_i32_0 : i32, i32
  }
  func.func @transform_6(%arg0: i32, %arg1: i32) -> (i32, i32) {
    %c0_i32 = arith.constant 0 : i32
    %c0_i32_0 = arith.constant 0 : i32
    %c0_i32_1 = arith.constant 0 : i32
    return %c0_i32, %c0_i32_0 : i32, i32
  }
  func.func @transform_7(%arg0: i32, %arg1: i32) -> (i32, i32) {
    %c0_i32 = arith.constant 0 : i32
    %c0_i32_0 = arith.constant 0 : i32
    %c0_i32_1 = arith.constant 0 : i32
    return %c0_i32, %c0_i32_0 : i32, i32
  }
  func.func @transform_8(%arg0: i32, %arg1: i32) -> (i32, i32, i32) {
    %c0_i32 = arith.constant 0 : i32
    %c0_i32_0 = arith.constant 0 : i32
    return %arg0, %arg1, %c0_i32 : i32, i32, i32
  }
}

</mosaic_0001>

<bundles_post_ra>
// kernel: tpu_custom_call.1
= control target key start
LH: loop header
LB: loop body
LE: loop exit
PB: predicated region body
PF: predicated region fallthrough
CT: control target
= control target key end

     0   :  { %s2136_s0 = inlined_call_operand.hbm [shape: f32[2,8,32], index: 0, kind: input, shape index: {}]   ;;  %s2137_s1 = inlined_call_operand.hbm [shape: f32[2,8,32], index: 1, kind: input, shape index: {}]   ;;  %s2138_s2 = inlined_call_operand.hbm [shape: bf16[32,32], index: 2, kind: input, shape index: {}]   ;;  %s2139_s3 = inlined_call_operand.hbm [shape: f32[1,32], index: 3, kind: input, shape index: {}]   ;;  %s2140_s4 = inlined_call_operand.hbm [shape: bf16[32,32], index: 4, kind: input, shape index: {}]   ;;  %s2141_s5 = inlined_call_operand.hbm [shape: f32[1,32], index: 5, kind: input, shape index: {}]   ;;  %s2142_s6 = inlined_call_operand.hbm [shape: bf16[32,32], index: 6, kind: input, shape index: {}]   ;;  %s2143_s7 = inlined_call_operand.hbm [shape: f32[1,32], index: 7, kind: input, shape index: {}]   ;;  %s2144_s8 = inlined_call_operand.hbm [shape: f32[2,8,32], index: 8, kind: output, shape index: {}]  }
   0x1   :  { %2152 = sst [smem:[#allocation25_spill]] %s2138_s2 }
   0x2   :  { %2153 = sst [smem:[#allocation26_spill]] %s2139_s3 }
   0x3   :  { %2154 = sst [smem:[#allocation27_spill]] %s2140_s4 }
   0x4   :  { %2155 = sst [smem:[#allocation28_spill]] %s2141_s5 }
   0x5   :  { %2156 = sst [smem:[#allocation29_spill]] %s2142_s6 }
   0x6   :  { %2157 = sst [smem:[#allocation30_spill]] %s2144_s8 }
   0x7   :  { %13 = vsyncpa [#allocation3], 0 }
   0x8   :  { %15 = vsyncpa [#allocation3 + $0x1], 0 }
   0x9   :  { %16 = vsyncpa [#allocation6], 0 }
   0xa   :  { %18 = vsyncpa [#allocation6 + $0x1], 0 }
   0xb   :  { %19 = vsyncpa [#allocation9], 0 }
   0xc   :  { %20 = vsyncpa [#allocation12], 0 }
   0xd   :  { %21 = vsyncpa [#allocation15], 0 }
   0xe   :  { %22 = vsyncpa [#allocation4], 0 }
   0xf   :  { %24 = vsyncpa [#allocation4 + $0x1], 0  ;;  %s1711_s27 = smov 0   ;;  %s1713_s28 = smov 0  }
  0x10   :  { %s1715_s29 = smov 0   ;;  %s1717_s30 = smov 0  }
  0x11   :  { %s1719_s9 = smov 0   ;;  %s1721_s10 = smov 0  }
  0x12 LB: > { %2158 = sst [smem:[#allocation24_spill]] %s1641_s30  ;;  %s1742_s11 = sadd.s32 4294967295, %s1649_s10   ;;  %s1649_s10 = sphi %s1721_s10, %s30_s10   ;;  %s1645_s9 = sphi %s1719_s9, %s2193_s9   ;;  %s1641_s30 = sphi %s1717_s30, %s2192_s30   ;;  %s1637_s29 = sphi %s1715_s29, %s2191_s29   ;;  %s1633_s28 = sphi %s1713_s28, %s2190_s28   ;;  %s1629_s27 = sphi %s1711_s27, %s2189_s27  }
  0x13   : > { %p1064_p0 = scmp.ge.s32.totalorder %s1649_s10, 1  ;;  %p2146_p1 = scmp.eq.s32.totalorder %s1742_s11, 0 }
  0x14   : > { %p255_p2 = scmp.lt.s32.totalorder %s1649_s10, 3  ;;  %s1651_s13 = smov [#allocation7]  }
  0x15   : > { %s267_s14 = sshll.u32 %s1651_s13, 4  ;;  %s1652_s16 = smov [#allocation8]   ;;  %s1751_s14 = int_to_ptr.vmem [resolvable:$true] %s267_s14 }
  0x16   : > { %p1747_p3 = pnand %p1064_p0, %p255_p2  ;;  %s281_s17 = sshll.u32 %s1652_s16, 4  ;;  %s1762_s17 = int_to_ptr.vmem [resolvable:$true] %s281_s17 }
  0x17   : > { %s1653_s18 = smov [#allocation11]   ;;  %s2161_s2 = sld [smem:[#allocation25_spill]] }
  0x18   : > { %s2159_s12 = scalar_select %p1747_p3, 1, 0 }
  0x19   : > { %p1201_p4 = pneg %p1747_p3  ;;  %s1764_s19 = sshll.u32 %s1653_s18, 4  ;;  %s306_s19 = int_to_ptr.vmem [resolvable:$true] %s1764_s19 }
  0x1b   : > { %p1758_p6 = pnand %p1201_p4, %p2146_p1 }
  0x1d   : > { %s1319_s22 = scalar_lea.hbm %s2161_s2, 256  ;;  %p1774_p8 = pneg %p1758_p6 }
  0x1e   : > { %p1320_p7 = scmp.ne.s32.totalorder %s2161_s2, %s1319_s22  ;;  %p1326_p11 = scmp.lt.u32.totalorder %s1319_s22, %s2161_s2 }
  0x20   : > { %p1322_p9 = pnand %p1774_p8, %p1320_p7 }
  0x22   : > { %p1323_p10 = pneg %p1322_p9 }
  0x24   : > { %p1328_p12 = pnand %p1326_p11, %p1323_p10 }
  0x26   : > { %1331 = shalt.err (!%p1328_p12)
}
  0x27   : > { %s1332_s16 = scalar_lea.vmem %s1751_s14, 256  ;;  %p1340_p4 = scmp.lt.s32.totalorder %s1751_s14, %s1751_s14 }
  0x28   : > { %p1333_p13 = scmp.ne.s32.totalorder %s1751_s14, %s1332_s16  ;;  %p1341_p5 = scmp.lt.s32.totalorder %s1332_s16, %s1332_s16 }
  0x2a   : > { %p1335_p0 = pnand %p1333_p13, %p1774_p8  ;;  %p1342_p7 = por %p1341_p5, %p1340_p4 }
  0x2c   : > { %p1336_p2 = pneg %p1335_p0 }
  0x2e   : > { %p1343_p9 = pnand %p1342_p7, %p1336_p2 }
  0x30   : > { %1346 = shalt.err (!%p1343_p9)
}
  0x31   : > { %s2148_s18 = smov 64   ;;  %s1655_s20 = smov 4  }
  0x32   : > { %1204 = dma.hbm_to_vmem [thread:$0]  (!%p1758_p6), %s2161_s2, 256, %s1751_s14, [#allocation6], %s2148_s18, %s2148_s18, %s1655_s20  }
  0x33   : > { %s2163_s3 = sld [smem:[#allocation26_spill]] }
  0x39   : > { %s1347_s26 = scalar_lea.hbm %s2163_s3, 16 }
  0x3a   : > { %p1348_p5 = scmp.ne.s32.totalorder %s2163_s3, %s1347_s26  ;;  %p1354_p12 = scmp.lt.u32.totalorder %s1347_s26, %s2163_s3 }
  0x3c   : > { %p1350_p10 = pnand %p1348_p5, %p1774_p8 }
  0x3e   : > { %p1351_p11 = pneg %p1350_p10 }
  0x40   : > { %p1356_p13 = pnand %p1354_p12, %p1351_p11 }
  0x42   : > { %1359 = shalt.err (!%p1356_p13)
}
  0x43   : > { %s1360_s14 = scalar_lea.vmem %s1762_s17, 16  ;;  %s1367_s21 = scalar_lea.vmem %s1762_s17, 32 }
  0x44   : > { %p1361_p0 = scmp.ne.s32.totalorder %s1762_s17, %s1360_s14  ;;  %p1368_p7 = scmp.lt.s32.totalorder %s1762_s17, %s1762_s17 }
  0x45   : > { %p1369_p9 = scmp.lt.s32.totalorder %s1367_s21, %s1360_s14 }
  0x46   : > { %p1363_p2 = pnand %p1361_p0, %p1774_p8 }
  0x47   : > { %p1370_p5 = por %p1369_p9, %p1368_p7 }
  0x48   : > { %p1364_p4 = pneg %p1363_p2 }
  0x4a   : > { %p1371_p10 = pnand %p1370_p5, %p1364_p4 }
  0x4c   : > { %1374 = shalt.err (!%p1371_p10)
}
  0x4d   : > { %1207 = dma.hbm_to_vmem [thread:$0]  (!%p1758_p6), %s2163_s3, 16, %s1762_s17, [#allocation9]  }
  0x4e   : > { %s2164_s5 = sld [smem:[#allocation28_spill]] }
  0x54   : > { %s1375_s24 = scalar_lea.hbm %s2164_s5, 16 }
  0x55   : > { %p1376_p11 = scmp.ne.s32.totalorder %s2164_s5, %s1375_s24  ;;  %p1382_p0 = scmp.lt.u32.totalorder %s1375_s24, %s2164_s5 }
  0x57   : > { %p1378_p12 = pnand %p1376_p11, %p1774_p8 }
  0x59   : > { %p1379_p13 = pneg %p1378_p12 }
  0x5b   : > { %p1384_p2 = pnand %p1382_p0, %p1379_p13 }
  0x5d   : > { %1387 = shalt.err (!%p1384_p2)
}
  0x5e   : > { %s1388_s21 = scalar_lea.vmem %s306_s19, 16  ;;  %s1395_s17 = scalar_lea.vmem %s306_s19, 32 }
  0x5f   : > { %p1389_p4 = scmp.ne.s32.totalorder %s306_s19, %s1388_s21  ;;  %p1396_p5 = scmp.lt.s32.totalorder %s306_s19, %s306_s19 }
  0x60   : > { %p1397_p10 = scmp.lt.s32.totalorder %s1395_s17, %s1388_s21 }
  0x61   : > { %p1391_p7 = pnand %p1389_p4, %p1774_p8 }
  0x62   : > { %p1398_p1 = por %p1397_p10, %p1396_p5 }
  0x63   : > { %p1392_p9 = pneg %p1391_p7 }
  0x65   : > { %p1399_p3 = pnand %p1398_p1, %p1392_p9 }
  0x67   : > { %1402 = shalt.err (!%p1399_p3)
}
  0x68   : > { %1213 = dma.hbm_to_vmem [thread:$0]  (!%p1758_p6), %s2164_s5, 16, %s306_s19, [#allocation12]  }
  0x69   : > { %s1656_s22 = smov [#allocation10]   ;;  %s1657_s24 = smov [#allocation13]  }
  0x6a   : > { %s291_s23 = sshll.u32 %s1656_s22, 4  ;;  %s315_s26 = sshll.u32 %s1657_s24, 4  ;;  %s292_s23 = int_to_ptr.vmem [resolvable:$true] %s291_s23  ;;  %s316_s26 = int_to_ptr.vmem [resolvable:$true] %s315_s26 }
  0x6b   : > { %s2165_s4 = sld [smem:[#allocation27_spill]] }
  0x71   : > { %s1403_s14 = scalar_lea.hbm %s2165_s4, 256 }
  0x72   : > { %p1404_p1 = scmp.ne.s32.totalorder %s2165_s4, %s1403_s14  ;;  %p1410_p12 = scmp.lt.u32.totalorder %s1403_s14, %s2165_s4 }
  0x74   : > { %p1406_p3 = pnand %p1404_p1, %p1774_p8 }
  0x76   : > { %p1407_p11 = pneg %p1406_p3 }
  0x78   : > { %p1412_p13 = pnand %p1410_p12, %p1407_p11 }
  0x7a   : > { %1415 = shalt.err (!%p1412_p13)
}
  0x7b   : > { %s1416_s19 = scalar_lea.vmem %s292_s23, 256  ;;  %p1424_p7 = scmp.lt.s32.totalorder %s292_s23, %s292_s23 }
  0x7c   : > { %p1417_p0 = scmp.ne.s32.totalorder %s292_s23, %s1416_s19  ;;  %p1425_p9 = scmp.lt.s32.totalorder %s1416_s19, %s1416_s19 }
  0x7e   : > { %p1419_p2 = pnand %p1417_p0, %p1774_p8  ;;  %p1426_p5 = por %p1425_p9, %p1424_p7 }
  0x80   : > { %p1420_p4 = pneg %p1419_p2 }
  0x82   : > { %p1427_p10 = pnand %p1426_p5, %p1420_p4 }
  0x84   : > { %1430 = shalt.err (!%p1427_p10)
}
  0x85   : > { %s2166_s30 = smov 64   ;;  %s2167_s6 = sld [smem:[#allocation29_spill]] }
  0x86   : > { %1210 = dma.hbm_to_vmem [thread:$0]  (!%p1758_p6), %s2165_s4, 256, %s292_s23, [#allocation9], %s2166_s30, %s2166_s30, %s1655_s20  }
  0x8b   : > { %s1431_s16 = scalar_lea.hbm %s2167_s6, 256 }
  0x8c   : > { %p1432_p1 = scmp.ne.s32.totalorder %s2167_s6, %s1431_s16  ;;  %p1438_p12 = scmp.lt.u32.totalorder %s1431_s16, %s2167_s6 }
  0x8e   : > { %p1434_p3 = pnand %p1432_p1, %p1774_p8 }
  0x90   : > { %p1435_p11 = pneg %p1434_p3 }
  0x92   : > { %p1440_p13 = pnand %p1438_p12, %p1435_p11 }
  0x94   : > { %1443 = shalt.err (!%p1440_p13)
}
  0x95   : > { %s1444_s19 = scalar_lea.vmem %s316_s26, 256  ;;  %p1452_p7 = scmp.lt.s32.totalorder %s316_s26, %s316_s26 }
  0x96   : > { %p1445_p0 = scmp.ne.s32.totalorder %s316_s26, %s1444_s19  ;;  %p1453_p9 = scmp.lt.s32.totalorder %s1444_s19, %s1444_s19 }
  0x98   : > { %p1447_p2 = pnand %p1445_p0, %p1774_p8  ;;  %p1454_p5 = por %p1453_p9, %p1452_p7 }
  0x9a   : > { %p1448_p4 = pneg %p1447_p2 }
  0x9c   : > { %p1455_p10 = pnand %p1454_p5, %p1448_p4 }
  0x9e   : > { %1458 = shalt.err (!%p1455_p10)
}
  0x9f   : > { %1216 = dma.hbm_to_vmem [thread:$0]  (!%p1758_p6), %s2167_s6, 256, %s316_s26, [#allocation12], %s2166_s30, %s2166_s30, %s1655_s20  }
  0xa0   : > { %s1658_s22 = smov [#allocation14]   ;;  %s1459_s14 = scalar_lea.hbm %s2143_s7, 16 }
  0xa1   : > { %s329_s24 = sshll.u32 %s1658_s22, 4  ;;  %p1460_p1 = scmp.ne.s32.totalorder %s2143_s7, %s1459_s14  ;;  %s330_s24 = int_to_ptr.vmem [resolvable:$true] %s329_s24 }
  0xa2   : > { %p1466_p12 = scmp.lt.u32.totalorder %s1459_s14, %s2143_s7 }
  0xa3   : > { %p1462_p3 = pnand %p1460_p1, %p1774_p8 }
  0xa5   : > { %p1463_p11 = pneg %p1462_p3 }
  0xa7   : > { %p1468_p13 = pnand %p1466_p12, %p1463_p11 }
  0xa9   : > { %1471 = shalt.err (!%p1468_p13)
}
  0xaa   : > { %s1472_s20 = scalar_lea.vmem %s330_s24, 16  ;;  %s1479_s26 = scalar_lea.vmem %s330_s24, 32 }
  0xab   : > { %p1473_p0 = scmp.ne.s32.totalorder %s330_s24, %s1472_s20  ;;  %p1480_p7 = scmp.lt.s32.totalorder %s330_s24, %s330_s24 }
  0xac   : > { %p1481_p9 = scmp.lt.s32.totalorder %s1479_s26, %s1472_s20 }
  0xad   : > { %p1475_p2 = pnand %p1473_p0, %p1774_p8 }
  0xae   : > { %p1482_p5 = por %p1481_p9, %p1480_p7 }
  0xaf   : > { %p1476_p4 = pneg %p1475_p2 }
  0xb1   : > { %p1483_p10 = pnand %p1482_p5, %p1476_p4 }
  0xb3   : > { %1486 = shalt.err (!%p1483_p10)
}
  0xb4   : > { %1219 = dma.hbm_to_vmem [thread:$0]  (!%p1758_p6), %s2143_s7, 16, %s330_s24, [#allocation15]  }
  0xb5   : > { %s1063_s25 = sadd.s32 4294967294, %s1649_s10   ;;  %s42_s18 = sadd.s32 1, %s1645_s9 }
  0xb6   : > { %p44_p8 = scmp.ge.s32.totalorder %s42_s18, 2  ;;  %s49_s15 = sadd.s32 1, %s1637_s29 }
  0xb7   : > { %p56_p1 = scmp.ne.s32.totalorder %s1637_s29, %s1633_s28  ;;  %p57_p3 = scmp.eq.s32.totalorder %s1649_s10, 0 }
  0xb8   : > { %s2195_s18 = smov (%p44_p8, %s42_s18), 0  ;;  %p62_p12 = scmp.ne.s32.totalorder %s1633_s28, %s1629_s27 }
  0xb9   : > { %p1909_p11 = por %p57_p3, %p56_p1  ;;  %s46_s24 = ssub.s32 %s1645_s9, %s2195_s18 }
  0xba   : > { %p242_p6 = scmp.eq.s32.totalorder %s1742_s11, 1  ;;  %p47_p13 = scmp.eq.s32.totalorder %s46_s24, 0 }
  0xbb   : > { %p2169_p0 = scmp.eq.s32.totalorder %s1742_s11, 0  ;;  %p248_p7 = scmp.eq.s32.totalorder %s1063_s25, 1 }
  0xbc   : > { %p1924_p4 = por %p242_p6, %p56_p1  ;;  %p1237_p5 = scmp.lt.s32.totalorder %s1649_s10, 2 }
  0xbd   : > { %p1920_p2 = por %p2169_p0, %p62_p12  ;;  %p1931_p9 = por %p248_p7, %p62_p12 }
  0xbe   : > { %s2171_s16 = scalar_select %p1924_p4, 1, 0 }
  0xbf   : > { %s2170_s13 = scalar_select %p1920_p2, 1, 0 }
  0xc0   : > { %s1929_s14 = scalar_select %p47_p13, %s1637_s29, %s49_s15  }
  0xc1   : > { %s2172_s21 = scalar_select %p1931_p9, 1, 0 }
  0xc2   : > { %s340_s17 = sand.u32 1, %s1637_s29   ;;  %s1073_s8 = sshll.u32 %s1645_s9, 7 }
  0xc3   : > { %s1938_s19 = sshll.u32 %s340_s17, 3  ;;  %s1943_s30 = scalar_lea.hbm %s2136_s0, %s1073_s8 }
  0xc4   : > { %s344_s23 = scalar_lea.vmem [#allocation2], %s1938_s19  ;;  %p1948_p10 = pnand %p1237_p5, %p1909_p11 }
  0xc5   : > { %s351_s25 = sshll.u32 %s344_s23, 4  ;;  %s1957_s26 = scalar_lea.hbm %s2137_s1, %s1073_s8  ;;  %s1952_s25 = int_to_ptr.vmem [resolvable:$true] %s351_s25 }
  0xc6   : > { %s341_s2 = scalar_lea.sflag [#allocation3], %s340_s17  ;;  %s1487_s3 = scalar_lea.hbm %s1943_s30, 128 }
  0xc7   : > { %p1488_p8 = scmp.ne.s32.totalorder %s1943_s30, %s1487_s3  ;;  %p1489_p1 = pneg %p1948_p10 }
  0xc8   : > { %s1492_s4 = scalar_lea.hbm %s2136_s0, 256  ;;  %p1493_p12 = scmp.lt.u32.totalorder %s1943_s30, %s2136_s0 }
  0xc9   : > { %p1490_p3 = pnand %p1489_p1, %p1488_p8  ;;  %p1494_p6 = scmp.lt.u32.totalorder %s1492_s4, %s1487_s3 }
  0xca   : > { %p1496_p0 = scmp.lt.u32.totalorder %s1487_s3, %s1943_s30 }
  0xcb   : > { %p1491_p11 = pneg %p1490_p3  ;;  %p1495_p13 = por %p1494_p6, %p1493_p12 }
  0xcd   : > { %p1497_p7 = por %p1496_p0, %p1495_p13 }
  0xcf   : > { %p1498_p5 = pnand %p1497_p7, %p1491_p11 }
  0xd1   : > { %1501 = shalt.err (!%p1498_p5)
}
  0xd2   : > { %s1502_s17 = scalar_lea.vmem %s1952_s25, 128  ;;  %s1659_s8 = smov [#allocation2]  }
  0xd3   : > { %p1503_p8 = scmp.ne.s32.totalorder %s1952_s25, %s1502_s17  ;;  %s1507_s24 = sshll.u32 %s1659_s8, 4  ;;  %s1508_s24 = int_to_ptr.vmem [resolvable:$false] %s1507_s24 }
  0xd4   : > { %s1509_s5 = scalar_lea.vmem %s1508_s24, 256  ;;  %p1510_p4 = scmp.lt.s32.totalorder %s1952_s25, %s1508_s24 }
  0xd5   : > { %p1505_p3 = pnand %p1503_p8, %p1489_p1  ;;  %p1511_p12 = scmp.lt.s32.totalorder %s1509_s5, %s1502_s17 }
  0xd7   : > { %p1506_p9 = pneg %p1505_p3  ;;  %p1512_p6 = por %p1511_p12, %p1510_p4 }
  0xd9   : > { %p1513_p13 = pnand %p1512_p6, %p1506_p9 }
  0xdb   : > { %1516 = shalt.err (!%p1513_p13)
}
  0xdc   : > { %1223 = dma.hbm_to_vmem [thread:$0]  (!%p1948_p10), %s1943_s30, 128, %s1952_s25, %s341_s2  }
  0xdd   : > { %s358_s3 = sand.u32 1, %s1649_s10   ;;  %s362_s4 = scalar_lea.vmem [#allocation5], %s1938_s19 }
  0xde   : > { %s370_s6 = sshll.u32 %s362_s4, 4  ;;  %s359_s20 = scalar_lea.sflag [#allocation6], %s358_s3  ;;  %s371_s6 = int_to_ptr.vmem [resolvable:$true] %s370_s6 }
  0xdf   : > { %s1517_s22 = scalar_lea.hbm %s1957_s26, 128  ;;  %s1522_s8 = scalar_lea.hbm %s2137_s1, 256 }
  0xe0   : > { %p1518_p4 = scmp.ne.s32.totalorder %s1957_s26, %s1517_s22  ;;  %p1523_p0 = scmp.lt.u32.totalorder %s1957_s26, %s2137_s1 }
  0xe1   : > { %p1524_p7 = scmp.lt.u32.totalorder %s1522_s8, %s1517_s22  ;;  %p1526_p8 = scmp.lt.u32.totalorder %s1517_s22, %s1957_s26 }
  0xe2   : > { %p1520_p9 = pnand %p1518_p4, %p1489_p1 }
  0xe3   : > { %p1525_p5 = por %p1524_p7, %p1523_p0 }
  0xe4   : > { %p1521_p11 = pneg %p1520_p9 }
  0xe5   : > { %p1527_p3 = por %p1526_p8, %p1525_p5 }
  0xe7   : > { %p1528_p12 = pnand %p1527_p3, %p1521_p11 }
  0xe9   : > { %1531 = shalt.err (!%p1528_p12)
}
  0xea   : > { %s1532_s2 = scalar_lea.vmem %s371_s6, 128  ;;  %s1660_s19 = smov [#allocation5]  }
  0xeb   : > { %p1533_p6 = scmp.ne.s32.totalorder %s371_s6, %s1532_s2  ;;  %s1537_s30 = sshll.u32 %s1660_s19, 4  ;;  %s1538_s30 = int_to_ptr.vmem [resolvable:$false] %s1537_s30 }
  0xec   : > { %s1539_s25 = scalar_lea.vmem %s1538_s30, 256  ;;  %p1540_p9 = scmp.lt.s32.totalorder %s371_s6, %s1538_s30 }
  0xed   : > { %p1535_p13 = pnand %p1533_p6, %p1489_p1  ;;  %p1541_p2 = scmp.lt.s32.totalorder %s1539_s25, %s1532_s2 }
  0xef   : > { %p1536_p4 = pneg %p1535_p13  ;;  %p1542_p0 = por %p1541_p2, %p1540_p9 }
  0xf1   : > { %p1543_p7 = pnand %p1542_p0, %p1536_p4 }
  0xf3   : > { %1546 = shalt.err (!%p1543_p7)
}
  0xf4   : > { %1226 = dma.hbm_to_vmem [thread:$0]  (!%p1948_p10), %s1957_s26, 128, %s371_s6, %s359_s20  }
  0xf5   : > { %p2174_p11 = scmp.ne.s32.totalorder %s2159_s12, 0 }
  0xf6   : > { %s2008_s3 = sand.u32 (!%p2174_p11), 1, %s1633_s28   ;;  %p2175_p2 = scmp.ne.s32.totalorder (!%p2174_p11), %s2170_s13, 0 }
  0xf7   : > { %379 = sbr.rel (%p2174_p11) target bundleno = 1336 (0x538), region = 52  ;;  %s2011_s4 = sshll.u32 (!%p2174_p11), %s2008_s3, 3 }
  0xf8   : > { %s382_s22 = scalar_lea.sflag (!%p2174_p11), [#allocation3], %s2008_s3  ;;  %s385_s23 = scalar_lea.vmem (!%p2174_p11), [#allocation2], %s2011_s4 }
  0xfe   : > { %1600 = dma.done.wait (%p2175_p2), %s382_s22, 128  }
  0xff   : > { %1602 = vsyncadd (%p2175_p2), %s382_s22, 4294967168  ;;  %s390_s12 = sand.u32 1, %s1742_s11   ;;  %s394_s26 = scalar_lea.vmem [#allocation5], %s2011_s4 }
 0x100   : > { %s391_s15 = scalar_lea.sflag [#allocation6], %s390_s12 }
 0x101   : > { %1604 = dma.done.wait (%p2175_p2), %s391_s15, 128  }
 0x102   : > { %1606 = vsyncadd (%p2175_p2), %s391_s15, 4294967168  ;;  %p2176_p10 = scmp.eq.s32.totalorder %s1742_s11, 0 }
 0x104   : > { %1608 = dma.done.wait (%p2176_p10), [#allocation6], 256   ;;  %p2177_p1 = pmov %p2176_p10 }
 0x106   : > { %1610 = vsyncadd (%p2177_p1), [#allocation6], 4294967040  ;;  %p2178_p5 = pmov %p2177_p1 }
 0x107   : > { %p2179_p8 = pmov %p2177_p1 }
 0x108   : > { %1612 = dma.done.wait (%p2178_p5), [#allocation9], 272  }
 0x109   : > { %1614 = vsyncadd (%p2179_p8), [#allocation9], 4294967024  ;;  %p2180_p3 = pmov %p2177_p1 }
 0x10a   : > { %p2181_p12 = pmov %p2177_p1 }
 0x10b   : > { %1616 = dma.done.wait (%p2180_p3), [#allocation12], 272  }
 0x10c   : > { %1618 = vsyncadd (%p2181_p12), [#allocation12], 4294967024  ;;  %p2182_p6 = pmov %p2177_p1 }
 0x10d   : > { %p2183_p13 = pmov %p2177_p1 }
 0x10e   : > { %1620 = dma.done.wait (%p2182_p6), [#allocation15], 16  }
 0x10f   : > { %1622 = vsyncadd (%p2183_p13), [#allocation15], 4294967280  ;;  %v1661_v0 = vmov 0.0   ;;  %vm1662_vm0 = vmmov 0   ;;  %v1305_v1 = vld [vmem:[#allocation10] sm:$0xff]   ;;  %v1306_v2 = vld [vmem:[#allocation7] sm:$0xff]  }
 0x110   : > { %1131 = vmatprep.subr.bf16.mxu1 %v1661_v0  ;;  %1123 = vmatprep.subr.bf16.mxu0 %v1661_v0  ;;  %v1307_v3 = vld [vmem:[#allocation10 + $0x8] sm:$0xff]   ;;  %v1308_v5 = vld [vmem:[#allocation7 + $0x8] sm:$0xff]   ;;  %vm484_vm1 = vcmask 261120   ;;  %v1090_v9 = vld [vmem:[#allocation11] ss:$0 sm:$0xff]  ;;  %vm661_vm2 = vcmask 130048  }
 0x111   : > { %1135 = vmatprep.mubr.msk.bf16.mxu1 %vm1662_vm0, %v1661_v0  ;;  %1127 = vmatprep.mubr.msk.bf16.mxu0 %vm1662_vm0, %v1661_v0  ;;  %v457_v4 = vld [vmem:[%s385_s23] sm:$0xff]  ;;  %v459_v6 = vld [vmem:[%s394_s26] sm:$0xff]  ;;  %s1663_s11 = smov 112   ;;  %vm708_vm3 = vcmask 64512   ;;  %vm722_vm4 = vcmask 1043456   ;;  %s2184_s13 = sld [smem:[#allocation24_spill]] }
 0x112   : > { %1132 = vmatpush3.bf16.msra.mxu1 %v1305_v1  ;;  %1124 = vmatpush3.bf16.msra.mxu0 %v1306_v2  ;;  %v458_v7 = vpack.c.bf16 %v457_v4, %v457_v4  ;;  %v460_v8 = vpack.c.bf16 %v459_v6, %v459_v6  ;;  %v1086_v10 = vld [vmem:[#allocation8] ss:$0 sm:$0xff]  ;;  %v1309_v12 = vld [vmem:[#allocation13] sm:$0xff]   ;;  %v1094_v30 = vld [vmem:[#allocation14] ss:$0 sm:$0xff]  ;;  %s1664_s6 = smov 16  }
 0x113   : > { %1133 = vmatprep.subr.bf16.mxu1 %v1661_v0  ;;  %1125 = vmatprep.subr.bf16.mxu0 %v1661_v0  ;;  %v1310_v19 = vld [vmem:[#allocation13 + $0x8] sm:$0xff]   ;;  %s455_s17 = scalar_lea.vmem [#allocation16], %s2011_s4  ;;  %s2185_s2 = sld [smem:[#allocation30_spill]] }
 0x114   : > { %s902_s8 = sshll.u32 %s455_s17, 4  ;;  %s888_s30 = scalar_lea.sflag [#allocation4], %s2008_s3  ;;  %s2087_s8 = int_to_ptr.vmem [resolvable:$true] %s902_s8 }
 0x115   : > { %s1547_s25 = scalar_lea.vmem %s2087_s8, 128  ;;  %p2186_p9 = scmp.ne.s32.totalorder %s2171_s16, 0 }
 0x116   : > { %1134 = vmatpush3.bf16.msra.mxu1 %v1307_v3  ;;  %1126 = vmatpush3.bf16.msra.mxu0 %v1308_v5  ;;  %p1548_p4 = scmp.ne.s32.totalorder %s2087_s8, %s1547_s25  ;;  %s1665_s4 = smov [#allocation16]  }
 0x117   : > { %1147 = vmatprep.subr.bf16.mxu1 %v1661_v0  ;;  %1139 = vmatprep.subr.bf16.mxu0 %v1661_v0  ;;  %s1103_s20 = sshll.u32 %s2184_s13, 7  ;;  %s1551_s22 = sshll.u32 %s1665_s4, 4  ;;  %s1552_s22 = int_to_ptr.vmem [resolvable:$false] %s1551_s22 }
 0x118   : > { %p1549_p0 = pnand %p1548_p4, %p2186_p9  ;;  %s1553_s23 = scalar_lea.vmem %s1552_s22, 256 }
 0x119   : > { %1136 = vmatmul.mubr.msk.bf16.vlgmr.msra.gmra.mrb[0].mxu1 %vm484_vm1, %v458_v7  ;;  %1128 = vmatmul.mubr.msk.bf16.vlgmr.msra.gmra.mrb[0].mxu0 %vm484_vm1, %v460_v8  ;;  %s2085_s19 = scalar_lea.hbm %s2185_s2, %s1103_s20  ;;  %p1554_p11 = scmp.lt.s32.totalorder %s2087_s8, %s1552_s22 }
 0x11a   : > { %1149 = vmatprep.mubr.msk.bf16.mxu1 %vm1662_vm0, %v1661_v0  ;;  %1143 = vmatprep.mubr.msk.bf16.mxu0 %vm1662_vm0, %v1661_v0  ;;  %p1550_p7 = pneg %p1549_p0  ;;  %p1555_p2 = scmp.lt.s32.totalorder %s1553_s23, %s1547_s25 }
 0x11b   : > { %1140 = vmatpush3.bf16.msra.mxu0 %v1309_v12 }
 0x11c   : > { %1141 = vmatprep.subr.bf16.mxu0 %v1661_v0  ;;  %p1556_p10 = por %p1555_p2, %p1554_p11 }
 0x11e   : > { %p1557_p1 = pnand %p1556_p10, %p1550_p7 }
 0x11f   : > { %1142 = vmatpush3.bf16.msra.mxu0 %v1310_v19 }
 0x120   : > { %1153 = vmatprep.subr.bf16.mxu0 %v1661_v0 }
 0x122   : > { %1144 = vmatmul.mubr.msk.bf16.vlgmr.msra.gmra.mrb[4].mxu0 %vm484_vm1, %v458_v7 }
 0x123   : > { %1155 = vmatprep.mubr.msk.bf16.mxu0 %vm1662_vm0, %v1661_v0 }
 0x1ec   : > { %v588_v11 = vpop.f32.mrb[0].mxu1  ;;  %v522_v15 = vpop.f32.mrb[0].mxu0 }
 0x1ed   : > { %v589_v13 = vadd.f32 %v1090_v9, %v588_v11  ;;  %v1137_v14 = vpop.f32.mrb[1].mxu1  ;;  %v523_v17 = vadd.f32 %v1086_v10, %v522_v15  ;;  %v1129_v18 = vpop.f32.mrb[1].mxu0 }
 0x1ee   : > { %v591_v16 = vpop.f32.mrb[2].mxu1  ;;  %v525_v22 = vpop.f32.mrb[2].mxu0 }
 0x1ef   : > { %v659_v20 = vpack.c.bf16 %v589_v13, %v589_v13  ;;  %v1138_v21 = vpop.f32.mrb[3].mxu1  ;;  %v657_v23 = vmul.f32 0.25, %v523_v17  ;;  %v1130_v24 = vpop.f32.mrb[3].mxu0 }
 0x1f1   : > { %v666_v25 = vsel %vm661_vm2, %v659_v20, 0  ;;  %772 = vrot.lane.b32.xlu0 %v659_v20, %s1663_s11  ;;  %v658_v26 = vpack.c.bf16 %v657_v23, %v657_v23 }
 0x1f2   : > { %1148 = vmatpush3.bf16.xpose.msra.mxu1 %v666_v25 }
 0x1f3   : > { %1159 = vmatprep.subr.bf16.mxu1 %v1661_v0 }
 0x1f5   : > { %769 = vrot.lane.b32.xlu0 %v658_v26, %s1663_s11  ;;  %v651_v31 = vpop.f32.mrb[4].mxu0 }
 0x1f6   : > { %v652_v32 = vadd.f32 %v1094_v30, %v651_v31  ;;  %v1145_v33 = vpop.f32.mrb[5].mxu0 }
 0x1f7   : > { %v654_v34 = vpop.f32.mrb[6].mxu0 }
 0x1f8   : > { %v660_v35 = vpack.c.bf16 %v652_v32, %v652_v32  ;;  %v1146_v36 = vpop.f32.mrb[7].mxu0 }
 0x1f9   : > { %1150 = vmatmul.mubr.msk.bf16.vlgmr.msra.gmra.mrb[4].mxu1 %vm661_vm2, %v658_v26 }
 0x1fa   : > { %1161 = vmatprep.mubr.msk.bf16.mxu1 %vm1662_vm0, %v1661_v0  ;;  %v724_v40 = vsel %vm722_vm4, %v660_v35, 0  ;;  %831 = vrot.lane.b32.xlu0 %v660_v35, %s1663_s11 }
 0x1fb   : > { %1154 = vmatpush3.bf16.msra.mxu0 %v724_v40 }
 0x1fc   : > { %1165 = vmatprep.subr.bf16.mxu0 %v1661_v0 }
 0x263   : > { %v773_v27 = vpop.permute.xlu0 %772 }
 0x264   : > { %v778_v28 = vsel %vm661_vm2, %v773_v27, 0 }
 0x265   : > { %1160 = vmatpush3.bf16.xpose.msra.mxu1 %v778_v28 }
 0x267   : > { %v770_v29 = vpop.permute.xlu0 %769 }
 0x26c   : > { %1162 = vmatmul.mubr.msk.bf16.vlgmr.msra.gmra.mrb[8].mxu1 %vm661_vm2, %v770_v29  ;;  %v832_v51 = vpop.permute.xlu0 %831 }
 0x26d   : > { %v837_v55 = vsel %vm722_vm4, %v832_v51, 0 }
 0x2cc   : > { %v702_v37 = vpop.f32.mrb[4].mxu1 }
 0x2cd   : > { %v1151_v38 = vpop.f32.mrb[5].mxu1  ;;  %v709_v39 = vsel %vm708_vm3, %v702_v37, -inf }
 0x2ce   : > { %710 = vmax.xlane.f32.xlu1 %v709_v39  ;;  %v705_v41 = vpop.f32.mrb[6].mxu1 }
 0x2cf   : > { %v1152_v42 = vpop.f32.mrb[7].mxu1 }
 0x33f   : > { %v814_v43 = vpop.f32.mrb[8].mxu1 }
 0x340   : > { %v1163_v44 = vpop.f32.mrb[9].mxu1  ;;  %v820_v45 = vsel %vm708_vm3, %v814_v43, -inf }
 0x341   : > { %821 = vmax.xlane.f32.xlu1 %v820_v45  ;;  %v817_v46 = vpop.f32.mrb[10].mxu1 }
 0x342   : > { %v1164_v47 = vpop.f32.mrb[11].mxu1 }
 0x35b   : > { %v711_v48 = vpop.xlane.xlu1 %710 }
 0x35c   : > { %v712_v49 = vsub.f32 %v702_v37, %v711_v48 }
 0x35e   : > { %v713_v50 = vmul.f32 1.442695, %v712_v49 }
 0x360   : > { %1311 = vpow2.f32 %v713_v50 }
 0x36a   : > { %v1312_v52 = vpop.eup %1311 }
 0x36b   : > { %v715_v53 = vsel %vm708_vm3, %v1312_v52, 0.0  ;;  %v718_v54 = vpack.c.bf16 %v1312_v52, %v1312_v52 }
 0x36c   : > { %716 = vadd.xlane.f32.xlu0 %v715_v53 }
 0x36d   : > { %1156 = vmatmul.mubr.msk.bf16.vlgmr.msra.gmra.mrb[8].mxu0 %vm708_vm3, %v718_v54 }
 0x36e   : > { %1166 = vmatpush3.bf16.msra.mxu0 %v837_v55  ;;  %1167 = vmatprep.mubr.msk.bf16.mxu0 %vm1662_vm0, %v1661_v0 }
 0x3ce   : > { %v822_v56 = vpop.xlane.xlu1 %821 }
 0x3cf   : > { %v823_v57 = vsub.f32 %v814_v43, %v822_v56 }
 0x3d1   : > { %v824_v58 = vmul.f32 1.442695, %v823_v57 }
 0x3d3   : > { %1313 = vpow2.f32 %v824_v58 }
 0x3dd   : > { %v1314_v59 = vpop.eup %1313 }
 0x3de   : > { %v826_v60 = vsel %vm708_vm3, %v1314_v59, 0.0  ;;  %v829_v61 = vpack.c.bf16 %v1314_v59, %v1314_v59 }
 0x3df   : > { %827 = vadd.xlane.f32.xlu1 %v826_v60 }
 0x3e0   : > { %1168 = vmatmul.mubr.msk.bf16.vlgmr.msra.gmra.mrb[12].mxu0 %vm708_vm3, %v829_v61 }
 0x3f9   : > { %v717_v9 = vpop.xlane.xlu0 %716 }
 0x440   : > { %v760_v62 = vpop.f32.mrb[8].mxu0 }
 0x441   : > { %v1157_v63 = vpop.f32.mrb[9].mxu0 }
 0x442   : > { %v763_v1 = vpop.f32.mrb[10].mxu0 }
 0x443   : > { %v1158_v2 = vpop.f32.mrb[11].mxu0 }
 0x46c   : > { %v828_v3 = vpop.xlane.xlu1 %827 }
 0x46d   : > { %1315 = vrcp.f32 %v828_v3 }
 0x46e   : > { %1317 = vrcp.f32 %v717_v9 }
 0x477   : > { %v1316_v0 = vpop.eup %1315 }
 0x478   : > { %v1318_v10 = vpop.eup %1317 }
 0x479   : > { %v767_v11 = vmul.f32 %v1318_v10, %v760_v62 }
 0x4b3   : > { %v873_v4 = vpop.f32.mrb[12].mxu0 }
 0x4b4   : > { %v880_v5 = vmul.f32 %v1316_v0, %v873_v4  ;;  %v1169_v6 = vpop.f32.mrb[13].mxu0 }
 0x4b5   : > { %v876_v7 = vpop.f32.mrb[14].mxu0 }
 0x4b6   : > { %v1170_v8 = vpop.f32.mrb[15].mxu0  ;;  %882 = vrot.lane.b32.xlu1 %v880_v5, %s1664_s6 }
 0x528   : > { %v883_v12 = vpop.permute.xlu1 %882 }
 0x529   : > { %v885_v13 = vsel %vm661_vm2, %v767_v11, %v883_v12 }
 0x52a   : > { %886 = vst.msk [vmem:[%s455_s17] sm:$0xff] %vm484_vm1, %v885_v13 }
 0x52b   : > { %1560 = shalt.err (!%p1557_p1)
}
 0x52c   : > { %s1561_s3 = scalar_lea.hbm %s2085_s19, 128  ;;  %s1565_s26 = scalar_lea.hbm %s2185_s2, 256 }
 0x52d   : > { %p1562_p5 = scmp.ne.s32.totalorder %s2085_s19, %s1561_s3  ;;  %p1566_p12 = scmp.lt.u32.totalorder %s2085_s19, %s2185_s2 }
 0x52e   : > { %p1567_p6 = scmp.lt.u32.totalorder %s1565_s26, %s1561_s3  ;;  %p1569_p4 = scmp.lt.u32.totalorder %s1561_s3, %s2085_s19 }
 0x52f   : > { %p1563_p8 = pnand %p1562_p5, %p2186_p9 }
 0x530   : > { %p1568_p13 = por %p1567_p6, %p1566_p12 }
 0x531   : > { %p1564_p3 = pneg %p1563_p8 }
 0x532   : > { %p1570_p0 = por %p1569_p4, %p1568_p13 }
 0x534   : > { %p1571_p7 = pnand %p1570_p0, %p1564_p3 }
 0x536   : > { %1574 = shalt.err (!%p1571_p7)
}
 0x537   : > { %1199 = dma.vmem_to_hbm [thread:$0]  (%p2186_p9), %s2087_s8, 128, %s2085_s19, %s888_s30  }
 0x538 PF: > { %s914_s6 = sand.u32 1, %s1629_s27   ;;  %p2187_p11 = scmp.ne.s32.totalorder %s2172_s21, 0 }
 0x539   : > { %p2188_p2 = scmp.ge.s32.totalorder %s1649_s10, 2  ;;  %s915_s20 = scalar_lea.sflag [#allocation4], %s914_s6 }
 0x53b   : > { %p1228_p10 = pnand %p2188_p2, %p2187_p11 }
 0x53d   : > { %1624 = dma.done.wait (!%p1228_p10), %s915_s20, 128  }
 0x53e   : > { %1626 = vsyncadd (!%p1228_p10), %s915_s20, 4294967168  ;;  %s30_s10 = sadd.s32 1, %s1649_s10   ;;  %s2189_s27 = smov %s1633_s28 }
 0x53f   : > { %p27_p1 = scmp.ge.s32.totalorder %s30_s10, 4   ;;  %s2190_s28 = smov %s1637_s29 }
 0x540   : > { %s2191_s29 = smov %s1929_s14  ;;  %s2192_s30 = smov %s1645_s9 }
 0x541   : > { %s2193_s9 = smov %s2195_s18  ;;  %29 = sbr.rel (!%p27_p1) target bundleno = 18 (0x12), region = 134 }
 0x548   :  { %920 = vsyncpa [#allocation3], 1 }
 0x549   :  { %922 = vsyncpa [#allocation3 + $0x1], 1 }
 0x54a   :  { %923 = vsyncpa [#allocation6], 1 }
 0x54b   :  { %925 = vsyncpa [#allocation6 + $0x1], 1 }
 0x54c   :  { %926 = vsyncpa [#allocation9], 1 }
 0x54d   :  { %927 = vsyncpa [#allocation12], 1 }
 0x54e   :  { %928 = vsyncpa [#allocation15], 1 }
 0x54f   :  { %929 = vsyncpa [#allocation4], 1 }
 0x550   :  { %931 = vsyncpa [#allocation4 + $0x1], 1 }

</bundles_post_ra>
